<compile_context>
chip_gen: v6e
topology: v6e:2x2x1
jax: 0.10.0
libtpu: 0.0.40
codegen_flags: <defaults>
</compile_context>

<pallas_src>
import math

import jax
import jax.numpy as jnp
from jax.experimental import pallas as pl
from jax.experimental.pallas import tpu as pltpu

LN_EPS = 1e-5


# --------------------------------------------------------------------------
# Kernels
# --------------------------------------------------------------------------
def _skip_ln_rows_kernel(x_ref, skip_ref, gb_ref, o_ref):
    """Row-tiled path: block = (tile, vdim); LN reduce over the lane axis."""
    y = x_ref[...].astype(jnp.float32) + skip_ref[...].astype(jnp.float32)
    inv_n = 1.0 / y.shape[-1]
    mean = jnp.sum(y, axis=-1, keepdims=True) * inv_n
    c = y - mean
    # Two-pass (centered) variance: matches PyTorch LayerNorm tightly and has
    # no cancellation risk; extra VPU work is free in a bandwidth-bound kernel.
    var = jnp.sum(c * c, axis=-1, keepdims=True) * inv_n
    inv = jax.lax.rsqrt(var + LN_EPS)
    gb = gb_ref[...].astype(jnp.float32)  # (2, vdim): row 0 = gamma, row 1 = beta
    o_ref[...] = (c * inv * gb[0:1, :] + gb[1:2, :]).astype(o_ref.dtype)


def _skip_ln_folded_kernel(x_ref, skip_ref, gb_ref, m_ref, o_ref):
    """Lane-dense path for small vdim: block = (tile, 128) with G=128//vdim
    logical rows folded into the lane dimension.

    m_ref is a (128, 128) block-diagonal averaging matrix (1/vdim inside each
    vdim x vdim diagonal block, 0 elsewhere): one MXU matmul both reduces and
    broadcasts the per-group mean; a second does the centered variance. The
    MXU is otherwise idle, so the stats are effectively free and every HBM
    load/store stays an unmasked full-lane op.
    """
    y = x_ref[...].astype(jnp.float32) + skip_ref[...].astype(jnp.float32)
    m = m_ref[...]
    mean_b = jnp.dot(y, m, preferred_element_type=jnp.float32,
                     precision=jax.lax.Precision.HIGHEST)
    c = y - mean_b
    var_b = jnp.dot(c * c, m, preferred_element_type=jnp.float32,
                    precision=jax.lax.Precision.HIGHEST)
    inv = jax.lax.rsqrt(var_b + LN_EPS)
    gb = gb_ref[...].astype(jnp.float32)  # (2, 128): gamma / beta tiled G times
    o_ref[...] = (c * inv * gb[0:1, :] + gb[1:2, :]).astype(o_ref.dtype)


# --------------------------------------------------------------------------
# Tiling / budget helpers
# --------------------------------------------------------------------------
def _vmem_params():
    """(streamed-tile budget, vmem_limit_bytes), generation aware."""
    budget, limit = 24 << 20, 48 << 20      # v7x-safe: 64 MiB physical VMEM
    try:
        info = pltpu.get_tpu_info()
        cap = getattr(info, "vmem_capacity_bytes", None)
        if cap is not None and cap >= (96 << 20):   # v5e / v6e: 128 MiB physical
            budget, limit = 40 << 20, 96 << 20
    except Exception:
        pass  # unknown backend -> keep conservative defaults
    return budget, limit


def _pick_row_tile(rows, width, itemsize, vmem_budget_bytes):
    """Pick the row-tile size for a (rows, width) streamed layout."""
    # Sublane packing of the activation dtype: 8 rows (f32), 16 (bf16), 32 (i8).
    sub = max(8, 32 // max(itemsize, 1))
    if rows <= sub:
        return rows  # single full-extent block (always a legal block shape)
    # VMEM per tile row: 3 streamed buffers (x, skip, out) x 2 pipeline buffers
    # x itemsize, plus ~4 block-sized fp32 temporaries (y, centered, c^2, out).
    bytes_per_row = width * (6 * itemsize + 16)
    tile = vmem_budget_bytes // max(bytes_per_row, 1)
    tile = max(sub, (tile // sub) * sub)
    tile = min(tile, 1024)
    # Pipelining: aim for >= 4 grid steps (>= 2 per v7x TensorCore on the
    # "parallel" axis; plain double-buffer overlap on v5e/v6e) when rows allow.
    min_steps = min(4, pl.cdiv(rows, sub))
    tile = min(tile, max(sub, ((rows // min_steps) // sub) * sub))
    return max(sub, tile)


def _pick_fold(rows, vdim):
    """Fold factor G for the lane-dense path, or None to use the row path.

    Only fold to exactly 128 lanes (vdim must divide 128, rows % G == 0);
    wider folds would grow the stats matmuls toward an MXU bound.
    """
    if vdim % 128 == 0 or vdim > 128 or 128 % vdim != 0:
        return None
    g = 128 // vdim
    if rows % g != 0:
        return None
    return g


# --------------------------------------------------------------------------
# Public wrapper
# --------------------------------------------------------------------------
def skip_connection_ln(x, skip_connect_x, gamma, beta, *,
                       row_tile=None, vmem_budget_bytes=None):
    """out = LayerNorm(x + skip_connect_x) over the last dim.

    x, skip_connect_x: (..., vdim). gamma, beta: (vdim,). dropout p=0 -> identity.
    """
    orig_shape = x.shape
    vdim = orig_shape[-1]
    rows = int(math.prod(orig_shape[:-1])) if len(orig_shape) > 1 else 1

    budget, vmem_limit = _vmem_params()
    if vmem_budget_bytes is not None:
        budget = vmem_budget_bytes
    itemsize = jnp.dtype(x.dtype).itemsize

    gamma = gamma.reshape(vdim)
    beta = beta.reshape(vdim)
    compiler_params = pltpu.CompilerParams(
        dimension_semantics=("parallel",),
        vmem_limit_bytes=vmem_limit,
    )

    fold = _pick_fold(rows, vdim)
    if fold is not None:
        # ---- Lane-dense folded path (vdim divides 128) -------------------
        g = fold
        w = g * vdim                       # == 128
        rows_f = rows // g
        x2 = x.reshape(rows_f, w)          # contiguous collapse: free reshape
        s2 = skip_connect_x.reshape(rows_f, w)
        gb = jnp.stack([jnp.tile(gamma, g), jnp.tile(beta, g)], axis=0)  # (2, w)
        grp = jnp.arange(w, dtype=jnp.int32) // vdim
        m = (grp[:, None] == grp[None, :]).astype(jnp.float32) * (1.0 / vdim)

        tile = row_tile or _pick_row_tile(rows_f, w, itemsize, budget)
        grid = (pl.cdiv(rows_f, tile),)
        out = pl.pallas_call(
            _skip_ln_folded_kernel,
            out_shape=jax.ShapeDtypeStruct((rows_f, w), x.dtype),
            grid_spec=pltpu.PrefetchScalarGridSpec(
                num_scalar_prefetch=0,
                grid=grid,
                in_specs=[
                    pl.BlockSpec((tile, w), lambda i: (i, 0)),
                    pl.BlockSpec((tile, w), lambda i: (i, 0)),
                    pl.BlockSpec((2, w), lambda i: (0, 0)),
                    pl.BlockSpec((w, w), lambda i: (0, 0)),
                ],
                out_specs=pl.BlockSpec((tile, w), lambda i: (i, 0)),
            ),
            compiler_params=compiler_params,
        )(x2, s2, gb, m)
        return out.reshape(orig_shape)

    # ---- Row-tiled path (vdim a multiple of 128, or no legal fold) --------
    x2 = x.reshape(rows, vdim)
    s2 = skip_connect_x.reshape(rows, vdim)
    gb = jnp.stack([gamma, beta], axis=0)  # (2, vdim)

    tile = row_tile or _pick_row_tile(rows, vdim, itemsize, budget)
    grid = (pl.cdiv(rows, tile),)
    out = pl.pallas_call(
        _skip_ln_rows_kernel,
        out_shape=jax.ShapeDtypeStruct((rows, vdim), x.dtype),
        grid_spec=pltpu.PrefetchScalarGridSpec(
            num_scalar_prefetch=0,
            grid=grid,
            in_specs=[
                pl.BlockSpec((tile, vdim), lambda i: (i, 0)),
                pl.BlockSpec((tile, vdim), lambda i: (i, 0)),
                pl.BlockSpec((2, vdim), lambda i: (0, 0)),
            ],
            out_specs=pl.BlockSpec((tile, vdim), lambda i: (i, 0)),
        ),
        compiler_params=compiler_params,
    )(x2, s2, gb)
    return out.reshape(orig_shape)


# --------------------------------------------------------------------------
# Reference + tests
# --------------------------------------------------------------------------
def _reference(x, skip, gamma, beta):
    y = x.astype(jnp.float32) + skip.astype(jnp.float32)
    mean = jnp.mean(y, axis=-1, keepdims=True)
    var = jnp.mean((y - mean) ** 2, axis=-1, keepdims=True)
    return ((y - mean) / jnp.sqrt(var + LN_EPS)) * gamma + beta


def _check(shape, dtype, gamma, beta, key, tol):
    kx, ks = jax.random.split(key)
    x = jax.random.normal(kx, shape, dtype=jnp.float32).astype(dtype)
    s = jax.random.normal(ks, shape, dtype=jnp.float32).astype(dtype)
    out = jax.block_until_ready(skip_connection_ln(x, s, gamma, beta))
    ref = _reference(x, s, gamma, beta)
    assert out.shape == shape
    assert jnp.max(jnp.abs(out.astype(jnp.float32) - ref)) < tol, shape


if __name__ == "__main__":
    key = jax.random.PRNGKey(0)
    k0, k1, k2, k3 = jax.random.split(key, 4)

    # PyTorch LayerNorm init is ones/zeros; perturb slightly so the affine
    # transform is actually exercised.
    def affine(vdim):
        g = 1.0 + 0.01 * jnp.arange(vdim, dtype=jnp.float32)
        b = 0.001 * jnp.arange(vdim, dtype=jnp.float32)
        return g, b

    # Small shapes implied by the module: (batch, seq, vdim).
    # 1) vdim=32, rows=16 -> lane-dense folded path (MXU stats, 128-lane stores).
    g32, b32 = affine(32)
    _check((2, 8, 32), jnp.float32, g32, b32, k0, 1e-4)

    # 2) Ragged rows (rows=15, not foldable) -> row path with partial edge block.
    _check((3, 5, 32), jnp.float32, g32, b32, k1, 1e-5)

    # 3) vdim=128 -> already lane-dense row path.
    g128, b128 = affine(128)
    _check((2, 8, 128), jnp.float32, g128, b128, k2, 1e-5)

    # 4) bf16 activations -> exercises 16-row sublane rounding and the
    #    4-grid-step pipelining rule (rows=64, tile=16).
    _check((4, 16, 128), jnp.bfloat16, g128, b128, k3, 3e-2)

    print("KERNEL_OK")
</pallas_src>

<mosaic_0001>
module attributes {stable_mosaic.version = 11 : i64} {
  func.func @_skip_ln_folded_kernel(%arg0: i32, %arg1: memref<4x128xf32, #tpu.memory_space<vmem>>, %arg2: memref<4x128xf32, #tpu.memory_space<vmem>>, %arg3: memref<2x128xf32, #tpu.memory_space<vmem>>, %arg4: memref<128x128xf32, #tpu.memory_space<vmem>>, %arg5: memref<4x128xf32, #tpu.memory_space<vmem>>) attributes {dimension_semantics = [#tpu.dimension_semantics<parallel>], iteration_bounds = array<i64: 1>, scalar_prefetch = 0 : i64, scratch_operands = 0 : i64, tpu.core_type = #tpu.core_type<tc>, window_params = [{transform_indices = @transform_0, window_bounds = array<i64: 4, 128>}, {transform_indices = @transform_1, window_bounds = array<i64: 4, 128>}, {pipeline_mode = #tpu.pipeline_mode<synchronous>, transform_indices = @transform_2, window_bounds = array<i64: 2, 128>}, {pipeline_mode = #tpu.pipeline_mode<synchronous>, transform_indices = @transform_3, window_bounds = array<i64: 128, 128>}, {transform_indices = @transform_4, window_bounds = array<i64: 4, 128>}]} {
    %c0 = arith.constant 0 : index
    %c0_0 = arith.constant 0 : index
    %0 = vector.load %arg1[%c0, %c0_0] : memref<4x128xf32, #tpu.memory_space<vmem>>, vector<4x128xf32>
    %c0_1 = arith.constant 0 : index
    %c0_2 = arith.constant 0 : index
    %1 = vector.load %arg2[%c0_1, %c0_2] : memref<4x128xf32, #tpu.memory_space<vmem>>, vector<4x128xf32>
    %2 = arith.addf %0, %1 : vector<4x128xf32>
    %c0_3 = arith.constant 0 : index
    %c0_4 = arith.constant 0 : index
    %3 = vector.load %arg4[%c0_3, %c0_4] : memref<128x128xf32, #tpu.memory_space<vmem>>, vector<128x128xf32>
    %cst = arith.constant dense<0.000000e+00> : vector<4x128xf32>
    %4 = tpu.matmul %2, %3, %cst {dimension_numbers = #tpu.dot_dimension_numbers<[1], [0], [0], [1], [0, 0, 1, 1], [], []>, precision = #tpu.contract_precision<fp32>} : vector<4x128xf32>, vector<128x128xf32>, vector<4x128xf32> -> vector<4x128xf32>
    %5 = arith.subf %2, %4 : vector<4x128xf32>
    %6 = arith.mulf %5, %5 : vector<4x128xf32>
    %cst_5 = arith.constant dense<0.000000e+00> : vector<4x128xf32>
    %7 = tpu.matmul %6, %3, %cst_5 {dimension_numbers = #tpu.dot_dimension_numbers<[1], [0], [0], [1], [0, 0, 1, 1], [], []>, precision = #tpu.contract_precision<fp32>} : vector<4x128xf32>, vector<128x128xf32>, vector<4x128xf32> -> vector<4x128xf32>
    %cst_6 = arith.constant 9.99999974E-6 : f32
    %8 = vector.broadcast %cst_6 : f32 to vector<4x128xf32>
    %9 = arith.addf %7, %8 : vector<4x128xf32>
    %10 = math.rsqrt %9 : vector<4x128xf32>
    %c0_7 = arith.constant 0 : index
    %c0_8 = arith.constant 0 : index
    %11 = vector.load %arg3[%c0_7, %c0_8] : memref<2x128xf32, #tpu.memory_space<vmem>>, vector<2x128xf32>
    %12 = arith.mulf %5, %10 : vector<4x128xf32>
    %13 = vector.extract_strided_slice %11 {offsets = [0, 0], sizes = [1, 128], strides = [1, 1]} : vector<2x128xf32> to vector<1x128xf32>
    %14 = vector.broadcast %13 : vector<1x128xf32> to vector<4x128xf32>
    %15 = arith.mulf %12, %14 : vector<4x128xf32>
    %16 = vector.extract_strided_slice %11 {offsets = [1, 0], sizes = [1, 128], strides = [1, 1]} : vector<2x128xf32> to vector<1x128xf32>
    %17 = vector.broadcast %16 : vector<1x128xf32> to vector<4x128xf32>
    %18 = arith.addf %15, %17 : vector<4x128xf32>
    %c0_9 = arith.constant 0 : index
    %c0_10 = arith.constant 0 : index
    %19 = vector.load %arg5[%c0_9, %c0_10] : memref<4x128xf32, #tpu.memory_space<vmem>>, vector<4x128xf32>
    tpu.vector_store %arg5[%c0_9, %c0_10], %18 {strides = array<i32>} : memref<4x128xf32, #tpu.memory_space<vmem>>, vector<4x128xf32>,
    return
  }
  func.func @transform_0(%arg0: i32) -> (i32, i32) {
    %c0_i32 = arith.constant 0 : i32
    %c0_i32_0 = arith.constant 0 : i32
    return %arg0, %c0_i32 : i32, i32
  }
  func.func @transform_1(%arg0: i32) -> (i32, i32) {
    %c0_i32 = arith.constant 0 : i32
    %c0_i32_0 = arith.constant 0 : i32
    return %arg0, %c0_i32 : i32, i32
  }
  func.func @transform_2(%arg0: i32) -> (i32, i32) {
    %c0_i32 = arith.constant 0 : i32
    %c0_i32_0 = arith.constant 0 : i32
    %c0_i32_1 = arith.constant 0 : i32
    return %c0_i32, %c0_i32_0 : i32, i32
  }
  func.func @transform_3(%arg0: i32) -> (i32, i32) {
    %c0_i32 = arith.constant 0 : i32
    %c0_i32_0 = arith.constant 0 : i32
    %c0_i32_1 = arith.constant 0 : i32
    return %c0_i32, %c0_i32_0 : i32, i32
  }
  func.func @transform_4(%arg0: i32) -> (i32, i32) {
    %c0_i32 = arith.constant 0 : i32
    %c0_i32_0 = arith.constant 0 : i32
    return %arg0, %c0_i32 : i32, i32
  }
}

</mosaic_0001>

<bundles_post_ra>
// kernel: tpu_custom_call.1
= control target key start
LH: loop header
LB: loop body
LE: loop exit
PB: predicated region body
PF: predicated region fallthrough
CT: control target
= control target key end

     0   :  { %9 = vsyncpa [#allocation3], 0  ;;  %s2792_s0 = inlined_call_operand.hbm [shape: f32[4,128], index: 0, kind: input, shape index: {}]   ;;  %s2793_s1 = inlined_call_operand.hbm [shape: f32[4,128], index: 1, kind: input, shape index: {}]   ;;  %s2794_s2 = inlined_call_operand.vmem [shape: f32[2,128], index: 2, kind: input, shape index: {}]   ;;  %s2795_s3 = inlined_call_operand.hbm [shape: f32[128,128], index: 3, kind: input, shape index: {}]   ;;  %s2796_s4 = inlined_call_operand.hbm [shape: f32[4,128], index: 4, kind: output, shape index: {}]  }
   0x1   :  { %10 = vsyncpa [#allocation6], 0 }
   0x2   :  { %11 = vsyncpa [#allocation4], 0  ;;  %s2108_s15 = smov [#allocation5]   ;;  %s2109_s17 = smov [#allocation2]  }
   0x3   :  { %s28_s16 = sshll.u32 %s2108_s15, 4  ;;  %s18_s18 = sshll.u32 %s2109_s17, 4  ;;  %s29_s16 = int_to_ptr.vmem [resolvable:$true] %s28_s16  ;;  %s19_s18 = int_to_ptr.vmem [resolvable:$true] %s18_s18 }
   0x4   :  { %s2030_s19 = scalar_lea.vmem %s29_s16, 64  ;;  %p2035_p1 = scmp.lt.s32.totalorder %s29_s16, %s29_s16 }
   0x5   :  { %p2031_p0 = scmp.ne.s32.totalorder %s29_s16, %s2030_s19  ;;  %p2036_p2 = scmp.lt.s32.totalorder %s2030_s19, %s2030_s19 }
   0x7   :  { %p2037_p3 = por %p2036_p2, %p2035_p1 }
   0x9   :  { %p2038_p4 = pnand %p2037_p3, %p2031_p0 }
   0xb   :  { %2041 = shalt.err (!%p2038_p4)
}
   0xc   :  { %31 = dma.hbm_to_vmem [thread:$0]  %s2793_s1, 64, %s29_s16, [#allocation6]  }
   0xd   :  { %s2050_s22 = scalar_lea.vmem %s19_s18, 64  ;;  %p2055_p6 = scmp.lt.s32.totalorder %s19_s18, %s19_s18 }
   0xe   :  { %p2051_p5 = scmp.ne.s32.totalorder %s19_s18, %s2050_s22  ;;  %p2056_p7 = scmp.lt.s32.totalorder %s2050_s22, %s2050_s22 }
  0x10   :  { %p2057_p8 = por %p2056_p7, %p2055_p6 }
  0x12   :  { %p2058_p9 = pnand %p2057_p8, %p2051_p5 }
  0x14   :  { %2061 = shalt.err (!%p2058_p9)
}
  0x15   :  { %21 = dma.hbm_to_vmem [thread:$0]  %s2792_s0, 64, %s19_s18, [#allocation3]  }
  0x16   :  { %s2110_s25 = smov [#allocation7]  }
  0x17   :  { %s39_s26 = sshll.u32 %s2110_s25, 4  ;;  %s40_s26 = int_to_ptr.vmem [resolvable:$true] %s39_s26 }
  0x18   :  { %s2070_s27 = scalar_lea.vmem %s40_s26, 2048  ;;  %p2075_p11 = scmp.lt.s32.totalorder %s40_s26, %s40_s26 }
  0x19   :  { %p2071_p10 = scmp.ne.s32.totalorder %s40_s26, %s2070_s27  ;;  %p2076_p12 = scmp.lt.s32.totalorder %s2070_s27, %s2070_s27 }
  0x1b   :  { %p2077_p13 = por %p2076_p12, %p2075_p11 }
  0x1d   :  { %p2078_p0 = pnand %p2077_p13, %p2071_p10 }
  0x1f   :  { %2081 = shalt.err (!%p2078_p0)
}
  0x20   :  { %s2111_s1 = smov 128   ;;  %s2112_s28 = smov 8  }
  0x21   :  { %45 = dma.hbm_to_vmem [thread:$0]  %s2795_s3, 2048, %s40_s26, [#allocation6], %s2111_s1, %s2111_s1, %s2112_s28  }
  0x22   :  { %2102 = dma.done.wait [#allocation3], 64  }
  0x23   :  { %2103 = vsyncadd [#allocation3], 4294967232 }
  0x24   :  { %2104 = dma.done.wait [#allocation6], 2112  }
  0x25   :  { %2105 = vsyncadd [#allocation6], 4294965184  ;;  %v2113_v0 = vmov 0.0   ;;  %vm2114_vm0 = vmmov 0   ;;  %v73_v1 = vld [vmem:[#allocation7 + $0x78] sm:$0xff]  ;;  %v72_v2 = vld [vmem:[#allocation7 + $0x70] sm:$0xff] }
  0x26   :  { %1592 = vmatprep.subr.mxu0 %v2113_v0  ;;  %1627 = vmatprep.subr.mxu1 %v2113_v0  ;;  %v71_v3 = vld [vmem:[#allocation7 + $0x68] sm:$0xff]  ;;  %v2156_v4 = vand.u32 4294901760, %v73_v1  ;;  %v2158_v5 = vand.u32 4294901760, %v72_v2  ;;  %v70_v7 = vld [vmem:[#allocation7 + $0x60] sm:$0xff]  ;;  %v69_v8 = vld [vmem:[#allocation7 + $0x58] sm:$0xff]  ;;  %s2115_s5 = smov [#allocation8]  }
  0x27   :  { %1624 = vmatprep.mubr.msk.f32.mxu0 %vm2114_vm0, %v2113_v0  ;;  %1659 = vmatprep.mubr.msk.f32.mxu1 %vm2114_vm0, %v2113_v0  ;;  %v2160_v6 = vand.u32 4294901760, %v71_v3  ;;  %v68_v9 = vld [vmem:[#allocation7 + $0x50] sm:$0xff]  ;;  %v2162_v10 = vand.u32 4294901760, %v70_v7  ;;  %v2164_v11 = vand.u32 4294901760, %v69_v8  ;;  %v67_v13 = vld [vmem:[#allocation7 + $0x48] sm:$0xff]  ;;  %v66_v14 = vld [vmem:[#allocation7 + $0x40] sm:$0xff] }
  0x28   :  { %v2166_v12 = vand.u32 4294901760, %v68_v9  ;;  %1593 = vmatpush3.msra.mxu0 %v2156_v4  ;;  %v2170_v15 = vsub.f32 %v73_v1, %v2156_v4  ;;  %v2173_v16 = vsub.f32 %v72_v2, %v2158_v5  ;;  %v2175_v17 = vand.u32 4294901760, %v67_v13  ;;  %v65_v19 = vld [vmem:[#allocation7 + $0x38] sm:$0xff]  ;;  %v64_v26 = vld [vmem:[#allocation7 + $0x30] sm:$0xff]  ;;  %v63_v34 = vld [vmem:[#allocation7 + $0x28] sm:$0xff]  ;;  %s1378_s6 = sshll.u32 %s2115_s5, 4  ;;  %s1379_s6 = int_to_ptr.vmem [resolvable:$true] %s1378_s6 }
  0x29   :  { %v2178_v18 = vsub.f32 %v71_v3, %v2160_v6  ;;  %1594 = vmatprep.subr.mxu0 %v2113_v0  ;;  %v2182_v20 = vsub.f32 %v70_v7, %v2162_v10  ;;  %v2185_v21 = vsub.f32 %v69_v8, %v2164_v11  ;;  %v2197_v25 = vand.u32 4294901760, %v66_v14  ;;  %v62_v41 = vld [vmem:[#allocation7 + $0x20] sm:$0xff]  ;;  %v55_v48 = vld [vmem:[#allocation2] sm:$0xf]  ;;  %v56_v49 = vld [vmem:[#allocation5] sm:$0xf]  ;;  %p2087_p2 = scmp.lt.s32.totalorder %s1379_s6, %s1379_s6 }
  0x2a   :  { %1595 = vmatpush3.msra.mxu0 %v2158_v5  ;;  %v2189_v22 = vand.u32 4294901760, %v2170_v15  ;;  %v2192_v23 = vand.u32 4294901760, %v2173_v16  ;;  %v2203_v28 = vand.u32 4294901760, %v65_v19  ;;  %v2209_v30 = vsub.f32 %v68_v9, %v2166_v12  ;;  %v61_v51 = vld [vmem:[#allocation7 + $0x18] sm:$0xff]  ;;  %v60_v55 = vld [vmem:[#allocation7 + $0x10] sm:$0xff]  ;;  %v59_v62 = vld [vmem:[#allocation7 + $0x8] sm:$0xff] }
  0x2b   :  { %v2195_v24 = vand.u32 4294901760, %v2178_v18  ;;  %1596 = vmatprep.subr.mxu0 %v2113_v0  ;;  %v2201_v27 = vand.u32 4294901760, %v2182_v20  ;;  %v2206_v29 = vand.u32 4294901760, %v2185_v21  ;;  %v2219_v35 = vsub.f32 %v67_v13, %v2175_v17  ;;  %v58_v9 = vld [vmem:[#allocation7] sm:$0xff]  ;;  %s2082_s7 = scalar_lea.vmem %s1379_s6, 64 }
  0x2c   :  { %1597 = vmatpush3.msra.mxu0 %v2160_v6  ;;  %v169_v31 = vsub.f32 %v2170_v15, %v2189_v22  ;;  %v176_v32 = vsub.f32 %v2173_v16, %v2192_v23  ;;  %v2222_v36 = vand.u32 4294901760, %v64_v26  ;;  %v2232_v40 = vand.u32 4294901760, %v2209_v30  ;;  %p2083_p1 = scmp.ne.s32.totalorder %s1379_s6, %s2082_s7  ;;  %p2088_p3 = scmp.lt.s32.totalorder %s2082_s7, %s2082_s7 }
  0x2d   :  { %v183_v33 = vsub.f32 %v2178_v18, %v2195_v24  ;;  %1598 = vmatprep.subr.mxu0 %v2113_v0  ;;  %v190_v39 = vsub.f32 %v2182_v20, %v2201_v27  ;;  %v2235_v42 = vand.u32 4294901760, %v63_v34  ;;  %v2238_v43 = vsub.f32 %v66_v14, %v2197_v25 }
  0x2e   :  { %1599 = vmatpush3.msra.mxu0 %v2162_v10  ;;  %v2225_v37 = vand.u32 4294901760, %v169_v31  ;;  %v2227_v38 = vand.u32 4294901760, %v176_v32  ;;  %v197_v45 = vsub.f32 %v2185_v21, %v2206_v29  ;;  %v2247_v46 = vand.u32 4294901760, %v2219_v35  ;;  %p2089_p4 = por %p2088_p3, %p2087_p2 }
  0x2f   :  { %1600 = vmatprep.subr.mxu0 %v2113_v0  ;;  %v2242_v44 = vand.u32 4294901760, %v183_v33  ;;  %v2250_v47 = vsub.f32 %v65_v19, %v2203_v28  ;;  %v2254_v50 = vand.u32 4294901760, %v62_v41  ;;  %v2258_v52 = vand.u32 4294901760, %v190_v39 }
  0x30   :  { %1601 = vmatpush3.msra.mxu0 %v2164_v11  ;;  %1628 = vmatpush3.msra.mxu1 %v2225_v37  ;;  %v204_v53 = vsub.f32 %v2209_v30, %v2232_v40  ;;  %v2263_v54 = vand.u32 4294901760, %v2238_v43  ;;  %v2266_v56 = vsub.f32 %v64_v26, %v2222_v36  ;;  %v2273_v58 = vadd.f32 %v56_v49, %v55_v48  ;;  %p2090_p5 = pnand %p2089_p4, %p2083_p1 }
  0x31   :  { %1602 = vmatprep.subr.mxu0 %v2113_v0  ;;  %1629 = vmatprep.subr.mxu1 %v2113_v0  ;;  %2809 = vst [vmem:[#allocation12_spill] sm:$0xff] %v2258_v52  ;;  %v2271_v57 = vand.u32 4294901760, %v2250_v47  ;;  %v2277_v59 = vand.u32 4294901760, %v197_v45  ;;  %v211_v60 = vsub.f32 %v2219_v35, %v2247_v46  ;;  %v2281_v61 = vand.u32 4294901760, %v61_v51 }
  0x32   :  { %1603 = vmatpush3.msra.mxu0 %v2166_v12  ;;  %1630 = vmatpush3.msra.mxu1 %v2227_v38  ;;  %2810 = vst [vmem:[#allocation13_spill] sm:$0xff] %v2273_v58  ;;  %v2284_v63 = vsub.f32 %v63_v34, %v2235_v42  ;;  %v2288_v1 = vand.u32 4294901760, %v60_v55  ;;  %v2291_v2 = vand.u32 4294901760, %v2273_v58  ;;  %v2295_v3 = vand.u32 4294901760, %v204_v53 }
  0x33   :  { %1604 = vmatprep.subr.mxu0 %v2113_v0  ;;  %1631 = vmatprep.subr.mxu1 %v2113_v0  ;;  %2811 = vst [vmem:[#allocation14_spill] sm:$0xff] %v2277_v59  ;;  %v218_v7 = vsub.f32 %v2238_v43, %v2263_v54  ;;  %v2300_v8 = vand.u32 4294901760, %v2266_v56  ;;  %v2303_v13 = vsub.f32 %v62_v41, %v2254_v50  ;;  %v2309_v19 = vand.u32 4294901760, %v59_v62 }
  0x34   :  { %1605 = vmatpush3.msra.mxu0 %v2175_v17  ;;  %1632 = vmatpush3.msra.mxu1 %v2242_v44  ;;  %2812 = vst [vmem:[#allocation15_spill] sm:$0xff] %v2295_v3  ;;  %v225_v14 = vsub.f32 %v2250_v47, %v2271_v57  ;;  %v2313_v26 = vand.u32 4294901760, %v211_v60  ;;  %v2316_v31 = vand.u32 4294901760, %v2284_v63  ;;  %v2320_v32 = vsub.f32 %v2273_v58, %v2291_v2 }
  0x35   :  { %1606 = vmatprep.subr.mxu0 %v2113_v0  ;;  %1633 = vmatprep.subr.mxu1 %v2113_v0  ;;  %v2323_v33 = vsub.f32 %v61_v51, %v2281_v61  ;;  %v2327_v34 = vand.u32 4294901760, %v58_v9  ;;  %v2331_v39 = vand.u32 4294901760, %v218_v7  ;;  %v232_v41 = vsub.f32 %v2266_v56, %v2300_v8 }
  0x36   :  { %1607 = vmatpush3.msra.mxu0 %v2197_v25  ;;  %1634 = vmatpush3.msra.mxu1 %v2258_v52  ;;  %2813 = vst [vmem:[#allocation16_spill] sm:$0xff] %v2313_v26  ;;  %v2336_v45 = vand.u32 4294901760, %v2303_v13  ;;  %v2339_v48 = vsub.f32 %v60_v55, %v2288_v1  ;;  %v2343_v49 = vand.u32 4294901760, %v225_v14  ;;  %v239_v51 = vsub.f32 %v2284_v63, %v2316_v31 }
  0x37   :  { %1608 = vmatprep.subr.mxu0 %v2113_v0  ;;  %1635 = vmatprep.subr.mxu1 %v2113_v0  ;;  %2814 = vst [vmem:[#allocation17_spill] sm:$0xff] %v2331_v39  ;;  %v2351_v60 = vand.u32 4294901760, %v2323_v33  ;;  %v2354_v55 = vsub.f32 %v59_v62, %v2309_v19  ;;  %v2360_v7 = vand.u32 4294901760, %v232_v41  ;;  %v2368_v58 = vsub.f32 %v58_v9, %v2327_v34 }
  0x38   :  { %1609 = vmatpush3.msra.mxu0 %v2203_v28  ;;  %1636 = vmatpush3.msra.mxu1 %v2277_v59  ;;  %2815 = vst [vmem:[#allocation18_spill] sm:$0xff] %v2343_v49  ;;  %v246_v14 = vsub.f32 %v2303_v13, %v2336_v45  ;;  %v2365_v53 = vand.u32 4294901760, %v2339_v48  ;;  %v2374_v62 = vand.u32 4294901760, %v239_v51  ;;  %v2819_v41 = vand.u32 4294901760, %v2320_v32 }
  0x39   :  { %1610 = vmatprep.subr.mxu0 %v2113_v0  ;;  %1637 = vmatprep.subr.mxu1 %v2113_v0  ;;  %2816 = vst [vmem:[#allocation19_spill] sm:$0xff] %v2351_v60  ;;  %2817 = vst [vmem:[#allocation20_spill] sm:$0xff] %v2360_v7  ;;  %v2382_v9 = vand.u32 4294901760, %v2354_v55 }
  0x3a   :  { %1611 = vmatpush3.msra.mxu0 %v2222_v36  ;;  %1638 = vmatpush3.msra.mxu1 %v2295_v3  ;;  %2818 = vst [vmem:[#allocation21_spill] sm:$0xff] %v2365_v53  ;;  %v2388_v51 = vand.u32 4294901760, %v246_v14 }
  0x3b   :  { %1612 = vmatprep.subr.mxu0 %v2113_v0  ;;  %1639 = vmatprep.subr.mxu1 %v2113_v0  ;;  %2820 = vst [vmem:[#allocation22_spill] sm:$0xff] %v2382_v9  ;;  %v267_v14 = vsub.f32 %v2354_v55, %v2382_v9 }
  0x3c   :  { %1613 = vmatpush3.msra.mxu0 %v2235_v42  ;;  %1640 = vmatpush3.msra.mxu1 %v2313_v26  ;;  %v253_v26 = vsub.f32 %v2323_v33, %v2351_v60 }
  0x3d   :  { %1614 = vmatprep.subr.mxu0 %v2113_v0  ;;  %1641 = vmatprep.subr.mxu1 %v2113_v0 }
  0x3e   :  { %1615 = vmatpush3.msra.mxu0 %v2254_v50  ;;  %1642 = vmatpush3.msra.mxu1 %v2331_v39  ;;  %v158_v39 = vsub.f32 %v2320_v32, %v2819_v41  ;;  %v2393_v41 = vand.u32 4294901760, %v2368_v58  ;;  %v2399_v59 = vand.u32 4294901760, %v253_v26  ;;  %v2414_v26 = vand.u32 4294901760, %v267_v14 }
  0x3f   :  { %1616 = vmatprep.subr.mxu0 %v2113_v0  ;;  %1643 = vmatprep.subr.mxu1 %v2113_v0 }
  0x40   :  { %1617 = vmatpush3.msra.mxu0 %v2281_v61  ;;  %1644 = vmatpush3.msra.mxu1 %v2343_v49  ;;  %v260_v49 = vsub.f32 %v2339_v48, %v2365_v53  ;;  %2821 = vst [vmem:[#allocation23_spill] sm:$0xff] %v2393_v41  ;;  %v159_v3 = vand.u32 4294901760, %v158_v39  ;;  %v274_v52 = vsub.f32 %v2368_v58, %v2393_v41 }
  0x41   :  { %1618 = vmatprep.subr.mxu0 %v2113_v0  ;;  %1645 = vmatprep.subr.mxu1 %v2113_v0 }
  0x42   :  { %1619 = vmatpush3.msra.mxu0 %v2288_v1  ;;  %1646 = vmatpush3.msra.mxu1 %v2360_v7  ;;  %v2407_v7 = vand.u32 4294901760, %v260_v49  ;;  %v2420_v39 = vand.u32 4294901760, %v274_v52  ;;  %v2822_v52 = vand.u32 4294901760, %v2320_v32  ;;  %v2829_v49 = vld [vmem:[#allocation20_spill] sm:$0xff] }
  0x43   :  { %1620 = vmatprep.subr.mxu0 %v2113_v0  ;;  %1647 = vmatprep.subr.mxu1 %v2113_v0 }
  0x44   :  { %1621 = vmatpush3.msra.mxu0 %v2309_v19  ;;  %1648 = vmatpush3.msra.mxu1 %v2374_v62 }
  0x45   :  { %1622 = vmatprep.subr.mxu0 %v2113_v0  ;;  %1649 = vmatprep.subr.mxu1 %v2113_v0 }
  0x46   :  { %1623 = vmatpush3.msra.mxu0 %v2327_v34  ;;  %1650 = vmatpush3.msra.mxu1 %v2388_v51 }
  0x47   :  { %1651 = vmatprep.subr.mxu1 %v2113_v0  ;;  %1662 = vmatprep.subr.mxu0 %v2113_v0 }
  0x48   :  { %1625 = vmatmul.mubr.f32.vlgmr.msra.gmra.mxu0 %v159_v3  ;;  %1652 = vmatpush3.msra.mxu1 %v2399_v59  ;;  %v2827_v3 = vld [vmem:[#allocation17_spill] sm:$0xff] }
  0x49   :  { %1663 = vmatpush3.msra.mxu0 %v2170_v15  ;;  %1653 = vmatprep.subr.mxu1 %v2113_v0 }
  0x4a   :  { %1664 = vmatprep.subr.mxu0 %v2113_v0  ;;  %1654 = vmatpush3.msra.mxu1 %v2407_v7 }
  0x4b   :  { %1665 = vmatpush3.msra.mxu0 %v2173_v16  ;;  %1655 = vmatprep.subr.mxu1 %v2113_v0 }
  0x4c   :  { %1666 = vmatprep.subr.mxu0 %v2113_v0  ;;  %1656 = vmatpush3.msra.mxu1 %v2414_v26 }
  0x4d   :  { %1667 = vmatpush3.msra.mxu0 %v2178_v18  ;;  %1657 = vmatprep.subr.mxu1 %v2113_v0 }
  0x4e   :  { %1668 = vmatprep.subr.mxu0 %v2113_v0  ;;  %1658 = vmatpush3.msra.mxu1 %v2420_v39 }
  0x4f   :  { %1669 = vmatpush3.msra.mxu0 %v2182_v20  ;;  %1660 = vmatmul.mubr.f32.vlgmr.msra.gmra.mxu1 %v2291_v2 }
  0x50   :  { %1670 = vmatprep.subr.mxu0 %v2113_v0  ;;  %1697 = vmatprep.subr.mxu1 %v2113_v0 }
  0x51   :  { %1671 = vmatpush3.msra.mxu0 %v2185_v21  ;;  %1698 = vmatpush3.msra.mxu1 %v2156_v4 }
  0x52   :  { %1672 = vmatprep.subr.mxu0 %v2113_v0  ;;  %1699 = vmatprep.subr.mxu1 %v2113_v0 }
  0x53   :  { %1673 = vmatpush3.msra.mxu0 %v2209_v30  ;;  %1700 = vmatpush3.msra.mxu1 %v2158_v5 }
  0x54   :  { %1674 = vmatprep.subr.mxu0 %v2113_v0  ;;  %1701 = vmatprep.subr.mxu1 %v2113_v0 }
  0x55   :  { %1675 = vmatpush3.msra.mxu0 %v2219_v35  ;;  %1702 = vmatpush3.msra.mxu1 %v2160_v6 }
  0x56   :  { %1676 = vmatprep.subr.mxu0 %v2113_v0  ;;  %1703 = vmatprep.subr.mxu1 %v2113_v0 }
  0x57   :  { %1677 = vmatpush3.msra.mxu0 %v2238_v43  ;;  %1704 = vmatpush3.msra.mxu1 %v2162_v10 }
  0x58   :  { %1678 = vmatprep.subr.mxu0 %v2113_v0  ;;  %1705 = vmatprep.subr.mxu1 %v2113_v0 }
  0x59   :  { %1679 = vmatpush3.msra.mxu0 %v2250_v47  ;;  %1706 = vmatpush3.msra.mxu1 %v2164_v11 }
  0x5a   :  { %1680 = vmatprep.subr.mxu0 %v2113_v0  ;;  %1707 = vmatprep.subr.mxu1 %v2113_v0 }
  0x5b   :  { %1681 = vmatpush3.msra.mxu0 %v2266_v56  ;;  %1708 = vmatpush3.msra.mxu1 %v2166_v12 }
  0x5c   :  { %1682 = vmatprep.subr.mxu0 %v2113_v0  ;;  %1709 = vmatprep.subr.mxu1 %v2113_v0 }
  0x5d   :  { %1683 = vmatpush3.msra.mxu0 %v2284_v63  ;;  %1710 = vmatpush3.msra.mxu1 %v2175_v17 }
  0x5e   :  { %1684 = vmatprep.subr.mxu0 %v2113_v0  ;;  %1711 = vmatprep.subr.mxu1 %v2113_v0 }
  0x5f   :  { %1685 = vmatpush3.msra.mxu0 %v2303_v13  ;;  %1712 = vmatpush3.msra.mxu1 %v2197_v25 }
  0x60   :  { %1686 = vmatprep.subr.mxu0 %v2113_v0  ;;  %1713 = vmatprep.subr.mxu1 %v2113_v0 }
  0x61   :  { %1687 = vmatpush3.msra.mxu0 %v2323_v33  ;;  %1714 = vmatpush3.msra.mxu1 %v2203_v28 }
  0x62   :  { %1688 = vmatprep.subr.mxu0 %v2113_v0  ;;  %1715 = vmatprep.subr.mxu1 %v2113_v0 }
  0x63   :  { %1689 = vmatpush3.msra.mxu0 %v2339_v48  ;;  %1716 = vmatpush3.msra.mxu1 %v2222_v36 }
  0x64   :  { %1690 = vmatprep.subr.mxu0 %v2113_v0  ;;  %1717 = vmatprep.subr.mxu1 %v2113_v0 }
  0x65   :  { %1691 = vmatpush3.msra.mxu0 %v2354_v55  ;;  %1718 = vmatpush3.msra.mxu1 %v2235_v42 }
  0x66   :  { %1692 = vmatprep.subr.mxu0 %v2113_v0  ;;  %1719 = vmatprep.subr.mxu1 %v2113_v0 }
  0x67   :  { %1693 = vmatpush3.msra.mxu0 %v2368_v58  ;;  %1694 = vmatprep.mubr.msk.f32.mxu0 %vm2114_vm0, %v2113_v0 }
  0x68   :  { %1720 = vmatpush3.msra.mxu1 %v2254_v50  ;;  %1695 = vmatmul.mubr.f32.vlgmr.msra.gmra.mxu0 %v2320_v32  ;;  %v2828_v32 = vld [vmem:[#allocation18_spill] sm:$0xff] }
  0x69   :  { %1721 = vmatprep.subr.mxu1 %v2113_v0  ;;  %1732 = vmatprep.subr.mxu0 %v2113_v0 }
  0x6a   :  { %1722 = vmatpush3.msra.mxu1 %v2281_v61  ;;  %1733 = vmatpush3.msra.mxu0 %v2189_v22 }
  0x6b   :  { %1723 = vmatprep.subr.mxu1 %v2113_v0  ;;  %1734 = vmatprep.subr.mxu0 %v2113_v0 }
  0x6c   :  { %1724 = vmatpush3.msra.mxu1 %v2288_v1  ;;  %1735 = vmatpush3.msra.mxu0 %v2192_v23 }
  0x6d   :  { %1725 = vmatprep.subr.mxu1 %v2113_v0  ;;  %1736 = vmatprep.subr.mxu0 %v2113_v0 }
  0x6e   :  { %1726 = vmatpush3.msra.mxu1 %v2309_v19  ;;  %1737 = vmatpush3.msra.mxu0 %v2195_v24 }
  0x6f   :  { %1727 = vmatprep.subr.mxu1 %v2113_v0  ;;  %1738 = vmatprep.subr.mxu0 %v2113_v0 }
  0x70   :  { %1728 = vmatpush3.msra.mxu1 %v2327_v34  ;;  %1729 = vmatprep.mubr.msk.f32.mxu1 %vm2114_vm0, %v2113_v0 }
  0x71   :  { %1739 = vmatpush3.msra.mxu0 %v2201_v27  ;;  %1730 = vmatmul.mubr.f32.vlgmr.msra.gmra.mxu1 %v2822_v52 }
  0x72   :  { %1740 = vmatprep.subr.mxu0 %v2113_v0  ;;  %1767 = vmatprep.subr.mxu1 %v2113_v0 }
  0x73   :  { %1741 = vmatpush3.msra.mxu0 %v2206_v29  ;;  %1768 = vmatpush3.msra.mxu1 %v2156_v4 }
  0x74   :  { %1742 = vmatprep.subr.mxu0 %v2113_v0  ;;  %1769 = vmatprep.subr.mxu1 %v2113_v0 }
  0x75   :  { %1743 = vmatpush3.msra.mxu0 %v2232_v40  ;;  %1770 = vmatpush3.msra.mxu1 %v2158_v5 }
  0x76   :  { %1744 = vmatprep.subr.mxu0 %v2113_v0  ;;  %1771 = vmatprep.subr.mxu1 %v2113_v0 }
  0x77   :  { %1745 = vmatpush3.msra.mxu0 %v2247_v46  ;;  %1772 = vmatpush3.msra.mxu1 %v2160_v6 }
  0x78   :  { %1746 = vmatprep.subr.mxu0 %v2113_v0  ;;  %1773 = vmatprep.subr.mxu1 %v2113_v0 }
  0x79   :  { %1747 = vmatpush3.msra.mxu0 %v2263_v54  ;;  %1774 = vmatpush3.msra.mxu1 %v2162_v10 }
  0x7a   :  { %1748 = vmatprep.subr.mxu0 %v2113_v0  ;;  %1775 = vmatprep.subr.mxu1 %v2113_v0 }
  0x7b   :  { %1749 = vmatpush3.msra.mxu0 %v2271_v57  ;;  %1776 = vmatpush3.msra.mxu1 %v2164_v11 }
  0x7c   :  { %1750 = vmatprep.subr.mxu0 %v2113_v0  ;;  %1777 = vmatprep.subr.mxu1 %v2113_v0 }
  0x7d   :  { %1751 = vmatpush3.msra.mxu0 %v2300_v8  ;;  %1778 = vmatpush3.msra.mxu1 %v2166_v12 }
  0x7e   :  { %1752 = vmatprep.subr.mxu0 %v2113_v0  ;;  %1779 = vmatprep.subr.mxu1 %v2113_v0 }
  0x7f   :  { %1753 = vmatpush3.msra.mxu0 %v2316_v31  ;;  %1780 = vmatpush3.msra.mxu1 %v2175_v17 }
  0x80   :  { %1754 = vmatprep.subr.mxu0 %v2113_v0  ;;  %1781 = vmatprep.subr.mxu1 %v2113_v0 }
  0x81   :  { %1755 = vmatpush3.msra.mxu0 %v2336_v45  ;;  %1782 = vmatpush3.msra.mxu1 %v2197_v25 }
  0x82   :  { %1756 = vmatprep.subr.mxu0 %v2113_v0  ;;  %1783 = vmatprep.subr.mxu1 %v2113_v0 }
  0x83   :  { %1757 = vmatpush3.msra.mxu0 %v2351_v60  ;;  %1784 = vmatpush3.msra.mxu1 %v2203_v28 }
  0x84   :  { %1758 = vmatprep.subr.mxu0 %v2113_v0  ;;  %1785 = vmatprep.subr.mxu1 %v2113_v0 }
  0x85   :  { %1759 = vmatpush3.msra.mxu0 %v2365_v53  ;;  %1786 = vmatpush3.msra.mxu1 %v2222_v36 }
  0x86   :  { %1760 = vmatprep.subr.mxu0 %v2113_v0  ;;  %1787 = vmatprep.subr.mxu1 %v2113_v0 }
  0x87   :  { %1761 = vmatpush3.msra.mxu0 %v2382_v9  ;;  %1788 = vmatpush3.msra.mxu1 %v2235_v42 }
  0x88   :  { %1762 = vmatprep.subr.mxu0 %v2113_v0  ;;  %1789 = vmatprep.subr.mxu1 %v2113_v0 }
  0x89   :  { %1763 = vmatpush3.msra.mxu0 %v2393_v41  ;;  %1764 = vmatprep.mubr.msk.f32.mxu0 %vm2114_vm0, %v2113_v0 }
  0x8a   :  { %1790 = vmatpush3.msra.mxu1 %v2254_v50  ;;  %1765 = vmatmul.mubr.f32.vlgmr.msra.gmra.mxu0 %v2291_v2 }
  0x8b   :  { %1791 = vmatprep.subr.mxu1 %v2113_v0  ;;  %1799 = vmatprep.mubr.msk.f32.mxu1 %vm2114_vm0, %v2113_v0 }
  0x8c   :  { %1792 = vmatpush3.msra.mxu1 %v2281_v61  ;;  %1802 = vmatprep.subr.mxu0 %v2113_v0 }
  0x8d   :  { %1793 = vmatprep.subr.mxu1 %v2113_v0  ;;  %1803 = vmatpush3.msra.mxu0 %v2156_v4 }
  0x8e   :  { %1794 = vmatpush3.msra.mxu1 %v2288_v1  ;;  %1804 = vmatprep.subr.mxu0 %v2113_v0 }
  0x8f   :  { %1795 = vmatprep.subr.mxu1 %v2113_v0  ;;  %1805 = vmatpush3.msra.mxu0 %v2158_v5 }
  0x90   :  { %1796 = vmatpush3.msra.mxu1 %v2309_v19  ;;  %1806 = vmatprep.subr.mxu0 %v2113_v0 }
  0x91   :  { %1797 = vmatprep.subr.mxu1 %v2113_v0  ;;  %1807 = vmatpush3.msra.mxu0 %v2160_v6 }
  0x92   :  { %1798 = vmatpush3.msra.mxu1 %v2327_v34  ;;  %1808 = vmatprep.subr.mxu0 %v2113_v0 }
  0x93   :  { %1800 = vmatmul.mubr.f32.vlgmr.msra.gmra.mxu1 %v2291_v2  ;;  %1837 = vmatprep.subr.mxu1 %v2113_v0  ;;  %v2826_v2 = vld [vmem:[#allocation16_spill] sm:$0xff] }
  0x94   :  { %1838 = vmatpush3.msra.mxu1 %v2225_v37  ;;  %1809 = vmatpush3.msra.mxu0 %v2162_v10  ;;  %v2823_v37 = vld [vmem:[#allocation12_spill] sm:$0xff] }
  0x95   :  { %1839 = vmatprep.subr.mxu1 %v2113_v0  ;;  %1810 = vmatprep.subr.mxu0 %v2113_v0 }
  0x96   :  { %1840 = vmatpush3.msra.mxu1 %v2227_v38  ;;  %1811 = vmatpush3.msra.mxu0 %v2164_v11  ;;  %v2824_v38 = vld [vmem:[#allocation14_spill] sm:$0xff] }
  0x97   :  { %1841 = vmatprep.subr.mxu1 %v2113_v0  ;;  %1812 = vmatprep.subr.mxu0 %v2113_v0 }
  0x98   :  { %1842 = vmatpush3.msra.mxu1 %v2242_v44  ;;  %1813 = vmatpush3.msra.mxu0 %v2166_v12  ;;  %v2825_v44 = vld [vmem:[#allocation15_spill] sm:$0xff] }
  0x99   :  { %1843 = vmatprep.subr.mxu1 %v2113_v0  ;;  %1814 = vmatprep.subr.mxu0 %v2113_v0 }
  0x9a   :  { %1844 = vmatpush3.msra.mxu1 %v2823_v37  ;;  %1815 = vmatpush3.msra.mxu0 %v2175_v17 }
  0x9b   :  { %1845 = vmatprep.subr.mxu1 %v2113_v0  ;;  %1816 = vmatprep.subr.mxu0 %v2113_v0 }
  0x9c   :  { %1846 = vmatpush3.msra.mxu1 %v2824_v38  ;;  %1817 = vmatpush3.msra.mxu0 %v2197_v25 }
  0x9d   :  { %1847 = vmatprep.subr.mxu1 %v2113_v0  ;;  %1818 = vmatprep.subr.mxu0 %v2113_v0 }
  0x9e   :  { %1848 = vmatpush3.msra.mxu1 %v2825_v44  ;;  %1819 = vmatpush3.msra.mxu0 %v2203_v28 }
  0x9f   :  { %1849 = vmatprep.subr.mxu1 %v2113_v0  ;;  %1820 = vmatprep.subr.mxu0 %v2113_v0 }
  0xa0   :  { %1850 = vmatpush3.msra.mxu1 %v2826_v2  ;;  %1821 = vmatpush3.msra.mxu0 %v2222_v36 }
  0xa1   :  { %1851 = vmatprep.subr.mxu1 %v2113_v0  ;;  %1822 = vmatprep.subr.mxu0 %v2113_v0 }
  0xa2   :  { %1852 = vmatpush3.msra.mxu1 %v2827_v3  ;;  %1823 = vmatpush3.msra.mxu0 %v2235_v42 }
  0xa3   :  { %1853 = vmatprep.subr.mxu1 %v2113_v0  ;;  %1824 = vmatprep.subr.mxu0 %v2113_v0 }
  0xa4   :  { %1854 = vmatpush3.msra.mxu1 %v2828_v32  ;;  %1825 = vmatpush3.msra.mxu0 %v2254_v50 }
  0xa5   :  { %1855 = vmatprep.subr.mxu1 %v2113_v0  ;;  %1826 = vmatprep.subr.mxu0 %v2113_v0 }
  0xa6   :  { %1856 = vmatpush3.msra.mxu1 %v2829_v49  ;;  %1869 = vmatprep.mubr.msk.f32.mxu1 %vm2114_vm0, %v2113_v0 }
  0xa7   :  { %1857 = vmatprep.subr.mxu1 %v2113_v0  ;;  %1827 = vmatpush3.msra.mxu0 %v2281_v61 }
  0xa8   :  { %1858 = vmatpush3.msra.mxu1 %v2374_v62  ;;  %1828 = vmatprep.subr.mxu0 %v2113_v0 }
  0xa9   :  { %1859 = vmatprep.subr.mxu1 %v2113_v0  ;;  %1829 = vmatpush3.msra.mxu0 %v2288_v1 }
  0xaa   :  { %1860 = vmatpush3.msra.mxu1 %v2388_v51  ;;  %1830 = vmatprep.subr.mxu0 %v2113_v0 }
  0xab   :  { %1861 = vmatprep.subr.mxu1 %v2113_v0  ;;  %1831 = vmatpush3.msra.mxu0 %v2309_v19 }
  0xac   :  { %1862 = vmatpush3.msra.mxu1 %v2399_v59  ;;  %1832 = vmatprep.subr.mxu0 %v2113_v0 }
  0xad   :  { %1863 = vmatprep.subr.mxu1 %v2113_v0  ;;  %1833 = vmatpush3.msra.mxu0 %v2327_v34 }
  0xae   :  { %1864 = vmatpush3.msra.mxu1 %v2407_v7  ;;  %1834 = vmatprep.mubr.msk.f32.mxu0 %vm2114_vm0, %v2113_v0 }
  0xaf   :  { %1865 = vmatprep.subr.mxu1 %v2113_v0  ;;  %1872 = vmatprep.subr.mxu0 %v2113_v0 }
  0xb0   :  { %1866 = vmatpush3.msra.mxu1 %v2414_v26 }
  0xb1   :  { %1867 = vmatprep.subr.mxu1 %v2113_v0 }
  0xb2   :  { %1868 = vmatpush3.msra.mxu1 %v2420_v39  ;;  %v2830_v39 = vld [vmem:[#allocation13_spill] sm:$0xff] }
  0xb3   :  { %1907 = vmatprep.subr.mxu1 %v2113_v0 }
 0x108   :  { %v161_v59 = vpop.f32.mrf.mxu0 }
 0x10a   :  { %v1626_v62 = vpop.f32.mrf.mxu0 }
 0x10f   :  { %v312_v51 = vpop.f32.mrf.mxu1 }
 0x110   :  { %v313_v2 = vadd.f32 %v312_v51, %v161_v59 }
 0x111   :  { %v1661_v14 = vpop.f32.mrf.mxu1 }
 0x128   :  { %v416_v7 = vpop.f32.mrf.mxu0 }
 0x129   :  { %v417_v32 = vadd.f32 %v416_v7, %v313_v2 }
 0x12a   :  { %v1696_v52 = vpop.f32.mrf.mxu0 }
 0x131   :  { %v505_v37 = vpop.f32.mrf.mxu1 }
 0x132   :  { %v506_v49 = vadd.f32 %v505_v37, %v417_v32 }
 0x133   :  { %v1731_v38 = vpop.f32.mrf.mxu1 }
 0x14a   :  { %v624_v44 = vpop.f32.mrf.mxu0 }
 0x14b   :  { %v625_v26 = vadd.f32 %v624_v44, %v506_v49 }
 0x14c   :  { %v1766_v3 = vpop.f32.mrf.mxu0 }
 0x153   :  { %v711_v41 = vpop.f32.mrf.mxu1 }
 0x154   :  { %v712_v9 = vadd.f32 %v711_v41, %v625_v26 }
 0x155   :  { %v1801_v53 = vpop.f32.mrf.mxu1 }
 0x156   :  { %v2636_v60 = vsub.f32 %v2830_v39, %v712_v9 }
 0x158   :  { %v716_v62 = vmul.f32 %v2636_v60, %v2636_v60 }
 0x15a   :  { %v2640_v14 = vand.u32 4294901760, %v716_v62 }
 0x15c   :  { %v2643_v52 = vsub.f32 %v716_v62, %v2640_v14  ;;  %1870 = vmatmul.mubr.f32.vlgmr.msra.gmra.mxu1 %v2640_v14 }
 0x15d   :  { %1908 = vmatpush3.msra.mxu1 %v2156_v4  ;;  %1939 = vmatprep.mubr.msk.f32.mxu1 %vm2114_vm0, %v2113_v0 }
 0x15e   :  { %1909 = vmatprep.subr.mxu1 %v2113_v0  ;;  %v800_v53 = vand.u32 4294901760, %v2643_v52 }
 0x15f   :  { %1910 = vmatpush3.msra.mxu1 %v2158_v5 }
 0x160   :  { %1911 = vmatprep.subr.mxu1 %v2113_v0  ;;  %v801_v9 = vsub.f32 %v2643_v52, %v800_v53 }
 0x161   :  { %1912 = vmatpush3.msra.mxu1 %v2160_v6 }
 0x162   :  { %1913 = vmatprep.subr.mxu1 %v2113_v0  ;;  %v802_v41 = vand.u32 4294901760, %v801_v9 }
 0x163   :  { %1914 = vmatpush3.msra.mxu1 %v2162_v10 }
 0x164   :  { %1915 = vmatprep.subr.mxu1 %v2113_v0  ;;  %1835 = vmatmul.mubr.f32.vlgmr.msra.gmra.mxu0 %v802_v41 }
 0x165   :  { %1873 = vmatpush3.msra.mxu0 %v2170_v15  ;;  %1916 = vmatpush3.msra.mxu1 %v2164_v11 }
 0x166   :  { %1874 = vmatprep.subr.mxu0 %v2113_v0  ;;  %1917 = vmatprep.subr.mxu1 %v2113_v0 }
 0x167   :  { %1875 = vmatpush3.msra.mxu0 %v2173_v16  ;;  %1918 = vmatpush3.msra.mxu1 %v2166_v12 }
 0x168   :  { %1876 = vmatprep.subr.mxu0 %v2113_v0  ;;  %1919 = vmatprep.subr.mxu1 %v2113_v0 }
 0x169   :  { %1877 = vmatpush3.msra.mxu0 %v2178_v18  ;;  %1920 = vmatpush3.msra.mxu1 %v2175_v17 }
 0x16a   :  { %1878 = vmatprep.subr.mxu0 %v2113_v0  ;;  %1921 = vmatprep.subr.mxu1 %v2113_v0 }
 0x16b   :  { %1879 = vmatpush3.msra.mxu0 %v2182_v20  ;;  %1922 = vmatpush3.msra.mxu1 %v2197_v25 }
 0x16c   :  { %1880 = vmatprep.subr.mxu0 %v2113_v0  ;;  %1923 = vmatprep.subr.mxu1 %v2113_v0 }
 0x16d   :  { %1881 = vmatpush3.msra.mxu0 %v2185_v21  ;;  %1924 = vmatpush3.msra.mxu1 %v2203_v28 }
 0x16e   :  { %1882 = vmatprep.subr.mxu0 %v2113_v0  ;;  %1925 = vmatprep.subr.mxu1 %v2113_v0 }
 0x16f   :  { %1883 = vmatpush3.msra.mxu0 %v2209_v30  ;;  %1926 = vmatpush3.msra.mxu1 %v2222_v36 }
 0x170   :  { %1884 = vmatprep.subr.mxu0 %v2113_v0  ;;  %1927 = vmatprep.subr.mxu1 %v2113_v0 }
 0x171   :  { %1885 = vmatpush3.msra.mxu0 %v2219_v35  ;;  %1928 = vmatpush3.msra.mxu1 %v2235_v42 }
 0x172   :  { %1886 = vmatprep.subr.mxu0 %v2113_v0  ;;  %1929 = vmatprep.subr.mxu1 %v2113_v0 }
 0x173   :  { %1887 = vmatpush3.msra.mxu0 %v2238_v43  ;;  %1930 = vmatpush3.msra.mxu1 %v2254_v50  ;;  %v1359_v43 = vld [vmem:[%s2794_s2] sm:$0x3] }
 0x174   :  { %1888 = vmatprep.subr.mxu0 %v2113_v0  ;;  %1931 = vmatprep.subr.mxu1 %v2113_v0 }
 0x175   :  { %1889 = vmatpush3.msra.mxu0 %v2250_v47  ;;  %1932 = vmatpush3.msra.mxu1 %v2281_v61 }
 0x176   :  { %1890 = vmatprep.subr.mxu0 %v2113_v0  ;;  %1933 = vmatprep.subr.mxu1 %v2113_v0 }
 0x177   :  { %1891 = vmatpush3.msra.mxu0 %v2266_v56  ;;  %1934 = vmatpush3.msra.mxu1 %v2288_v1 }
 0x178   :  { %1892 = vmatprep.subr.mxu0 %v2113_v0  ;;  %1935 = vmatprep.subr.mxu1 %v2113_v0 }
 0x179   :  { %1893 = vmatpush3.msra.mxu0 %v2284_v63  ;;  %1936 = vmatpush3.msra.mxu1 %v2309_v19 }
 0x17a   :  { %1894 = vmatprep.subr.mxu0 %v2113_v0  ;;  %1937 = vmatprep.subr.mxu1 %v2113_v0 }
 0x17b   :  { %1895 = vmatpush3.msra.mxu0 %v2303_v13  ;;  %1938 = vmatpush3.msra.mxu1 %v2327_v34 }
 0x17c   :  { %1896 = vmatprep.subr.mxu0 %v2113_v0  ;;  %1940 = vmatmul.mubr.f32.vlgmr.msra.gmra.mxu1 %v800_v53 }
 0x17d   :  { %1977 = vmatprep.subr.mxu1 %v2113_v0  ;;  %1897 = vmatpush3.msra.mxu0 %v2323_v33 }
 0x17e   :  { %1978 = vmatpush3.msra.mxu1 %v2156_v4  ;;  %1898 = vmatprep.subr.mxu0 %v2113_v0  ;;  %v2831_v4 = vld [vmem:[#allocation19_spill] sm:$0xff] }
 0x17f   :  { %1979 = vmatprep.subr.mxu1 %v2113_v0  ;;  %1899 = vmatpush3.msra.mxu0 %v2339_v48 }
 0x180   :  { %1980 = vmatpush3.msra.mxu1 %v2158_v5  ;;  %1900 = vmatprep.subr.mxu0 %v2113_v0  ;;  %v2832_v5 = vld [vmem:[#allocation21_spill] sm:$0xff] }
 0x181   :  { %1981 = vmatprep.subr.mxu1 %v2113_v0  ;;  %1901 = vmatpush3.msra.mxu0 %v2354_v55 }
 0x182   :  { %1982 = vmatpush3.msra.mxu1 %v2160_v6  ;;  %1902 = vmatprep.subr.mxu0 %v2113_v0  ;;  %v2833_v6 = vld [vmem:[#allocation22_spill] sm:$0xff] }
 0x183   :  { %1983 = vmatprep.subr.mxu1 %v2113_v0  ;;  %1903 = vmatpush3.msra.mxu0 %v2368_v58 }
 0x184   :  { %1904 = vmatprep.mubr.msk.f32.mxu0 %vm2114_vm0, %v2113_v0  ;;  %1984 = vmatpush3.msra.mxu1 %v2162_v10  ;;  %v2834_v10 = vld [vmem:[#allocation23_spill] sm:$0xff] }
 0x185   :  { %1905 = vmatmul.mubr.f32.vlgmr.msra.gmra.mxu0 %v2643_v52  ;;  %1942 = vmatprep.subr.mxu0 %v2113_v0 }
 0x186   :  { %1985 = vmatprep.subr.mxu1 %v2113_v0  ;;  %1943 = vmatpush3.msra.mxu0 %v2189_v22 }
 0x187   :  { %1986 = vmatpush3.msra.mxu1 %v2164_v11  ;;  %1944 = vmatprep.subr.mxu0 %v2113_v0 }
 0x188   :  { %1987 = vmatprep.subr.mxu1 %v2113_v0  ;;  %1945 = vmatpush3.msra.mxu0 %v2192_v23 }
 0x189   :  { %1988 = vmatpush3.msra.mxu1 %v2166_v12  ;;  %1946 = vmatprep.subr.mxu0 %v2113_v0 }
 0x18a   :  { %1989 = vmatprep.subr.mxu1 %v2113_v0  ;;  %1947 = vmatpush3.msra.mxu0 %v2195_v24 }
 0x18b   :  { %1990 = vmatpush3.msra.mxu1 %v2175_v17  ;;  %1948 = vmatprep.subr.mxu0 %v2113_v0 }
 0x18c   :  { %1991 = vmatprep.subr.mxu1 %v2113_v0  ;;  %1949 = vmatpush3.msra.mxu0 %v2201_v27 }
 0x18d   :  { %1992 = vmatpush3.msra.mxu1 %v2197_v25  ;;  %1950 = vmatprep.subr.mxu0 %v2113_v0 }
 0x18e   :  { %1993 = vmatprep.subr.mxu1 %v2113_v0  ;;  %1951 = vmatpush3.msra.mxu0 %v2206_v29 }
 0x18f   :  { %1994 = vmatpush3.msra.mxu1 %v2203_v28  ;;  %1952 = vmatprep.subr.mxu0 %v2113_v0 }
 0x190   :  { %1995 = vmatprep.subr.mxu1 %v2113_v0  ;;  %1953 = vmatpush3.msra.mxu0 %v2232_v40 }
 0x191   :  { %1996 = vmatpush3.msra.mxu1 %v2222_v36  ;;  %1954 = vmatprep.subr.mxu0 %v2113_v0  ;;  %v1361_v36 = vlaneseq }
 0x192   :  { %1997 = vmatprep.subr.mxu1 %v2113_v0  ;;  %1955 = vmatpush3.msra.mxu0 %v2247_v46 }
 0x193   :  { %1998 = vmatpush3.msra.mxu1 %v2235_v42  ;;  %1956 = vmatprep.subr.mxu0 %v2113_v0  ;;  %v1362_v40 = vshrl.u32 %v1361_v36, 7 }
 0x194   :  { %1999 = vmatprep.subr.mxu1 %v2113_v0  ;;  %1957 = vmatpush3.msra.mxu0 %v2263_v54 }
 0x195   :  { %2000 = vmatpush3.msra.mxu1 %v2254_v50  ;;  %1958 = vmatprep.subr.mxu0 %v2113_v0  ;;  %v1363_v42 = vsub.s32 0, %v1362_v40  ;;  %v1368_v46 = vsub.s32 1, %v1362_v40 }
 0x196   :  { %2001 = vmatprep.subr.mxu1 %v2113_v0  ;;  %1959 = vmatpush3.msra.mxu0 %v2271_v57 }
 0x197   :  { %2002 = vmatpush3.msra.mxu1 %v2281_v61  ;;  %1960 = vmatprep.subr.mxu0 %v2113_v0  ;;  %v1364_v47 = vrot.slane %v1359_v43, %v1363_v42  ;;  %v1369_v56 = vrot.slane %v1359_v43, %v1368_v46 }
 0x198   :  { %2003 = vmatprep.subr.mxu1 %v2113_v0  ;;  %1961 = vmatpush3.msra.mxu0 %v2300_v8 }
 0x199   :  { %2004 = vmatpush3.msra.mxu1 %v2288_v1  ;;  %1962 = vmatprep.subr.mxu0 %v2113_v0 }
 0x19a   :  { %2005 = vmatprep.subr.mxu1 %v2113_v0  ;;  %1963 = vmatpush3.msra.mxu0 %v2316_v31 }
 0x19b   :  { %2006 = vmatpush3.msra.mxu1 %v2309_v19  ;;  %1964 = vmatprep.subr.mxu0 %v2113_v0 }
 0x19c   :  { %2007 = vmatprep.subr.mxu1 %v2113_v0  ;;  %1965 = vmatpush3.msra.mxu0 %v2336_v45 }
 0x19d   :  { %2008 = vmatpush3.msra.mxu1 %v2327_v34  ;;  %2009 = vmatprep.mubr.msk.f32.mxu1 %vm2114_vm0, %v2113_v0 }
 0x19e   :  { %1966 = vmatprep.subr.mxu0 %v2113_v0  ;;  %2010 = vmatmul.mubr.f32.vlgmr.msra.gmra.mxu1 %v2640_v14 }
 0x19f   :  { %1967 = vmatpush3.msra.mxu0 %v2831_v4  ;;  %1974 = vmatprep.mubr.msk.f32.mxu0 %vm2114_vm0, %v2113_v0 }
 0x1a0   :  { %1968 = vmatprep.subr.mxu0 %v2113_v0 }
 0x1a1   :  { %1969 = vmatpush3.msra.mxu0 %v2832_v5 }
 0x1a2   :  { %1970 = vmatprep.subr.mxu0 %v2113_v0 }
 0x1a3   :  { %1971 = vmatpush3.msra.mxu0 %v2833_v6 }
 0x1a4   :  { %1972 = vmatprep.subr.mxu0 %v2113_v0 }
 0x1a5   :  { %1973 = vmatpush3.msra.mxu0 %v2834_v10 }
 0x1a6   :  { %1975 = vmatmul.mubr.f32.vlgmr.msra.gmra.mxu0 %v2640_v14 }
 0x21c   :  { %v955_v11 = vpop.f32.mrf.mxu1 }
 0x21e   :  { %v1871_v12 = vpop.f32.mrf.mxu1 }
 0x224   :  { %v804_v15 = vpop.f32.mrf.mxu0 }
 0x225   :  { %v805_v22 = vadd.f32 1e-05, %v804_v15 }
 0x226   :  { %v1836_v16 = vpop.f32.mrf.mxu0 }
 0x227   :  { %v956_v24 = vadd.f32 %v955_v11, %v805_v22 }
 0x23c   :  { %v1148_v17 = vpop.f32.mrf.mxu1 }
 0x23e   :  { %v1941_v18 = vpop.f32.mrf.mxu1 }
 0x245   :  { %v1059_v20 = vpop.f32.mrf.mxu0 }
 0x246   :  { %v1060_v27 = vadd.f32 %v1059_v20, %v956_v24 }
 0x247   :  { %v1906_v21 = vpop.f32.mrf.mxu0 }
 0x248   :  { %v1149_v28 = vadd.f32 %v1148_v17, %v1060_v27 }
 0x25e   :  { %v1354_v23 = vpop.f32.mrf.mxu1 }
 0x260   :  { %v2011_v25 = vpop.f32.mrf.mxu1 }
 0x266   :  { %v1267_v29 = vpop.f32.mrf.mxu0 }
 0x267   :  { %v1268_v0 = vadd.f32 %v1267_v29, %v1149_v28 }
 0x268   :  { %v1976_v30 = vpop.f32.mrf.mxu0 }
 0x269   :  { %v1355_v35 = vadd.f32 %v1354_v23, %v1268_v0 }
 0x26b   :  { %2020 = vrsqrt.f32 %v1355_v35 }
 0x278   :  { %v2021_v50 = vpop.eup %2020 }
 0x279   :  { %v1360_v54 = vmul.f32 %v2021_v50, %v2636_v60 }
 0x27b   :  { %v1365_v57 = vmul.f32 %v1364_v47, %v1360_v54 }
 0x27d   :  { %v1370_v58 = vadd.f32 %v1369_v56, %v1365_v57 }
 0x27f   :  { %1371 = vst [vmem:[#allocation8] sm:$0xf] %v1370_v58 }
 0x280   :  { %2093 = shalt.err (!%p2090_p5)
}
 0x281   :  { %1381 = dma.vmem_to_hbm [thread:$0]  %s1379_s6, 64, %s2796_s4, [#allocation4]  }
 0x282   :  { %2106 = dma.done.wait [#allocation4], 64  }
 0x283   :  { %2107 = vsyncadd [#allocation4], 4294967232 }
 0x284   :  { %1385 = vsyncpa [#allocation3], 1 }
 0x285   :  { %1386 = vsyncpa [#allocation6], 1 }
 0x286   :  { %1387 = vsyncpa [#allocation4], 1 }

</bundles_post_ra>
